<compile_context>
chip_gen: v6e
topology: v6e:2x2x1
jax: 0.10.0
libtpu: 0.0.40
codegen_flags: <defaults>
</compile_context>

<pallas_src>
import jax
import jax.numpy as jnp
from jax.experimental import pallas as pl
from jax.experimental.pallas import tpu as pltpu

_TN_MAX = 4096   # row tile; ~16 MiB of double-buffered pipeline tiles + temps


def _cdiv(a, b):
    return (a + b - 1) // b


def _round_up(x, m):
    return (x + m - 1) // m * m


def _tiling(n):
    # Largest tile (fewer grid steps amortize per-step overhead) but keep the
    # grid length >= 2 when n allows it so dimension_semantics=("parallel",)
    # actually shards row blocks across both TensorCores on v7x.
    tn = min(_TN_MAX, max(8, _round_up(_cdiv(n, 2), 8)))
    return tn, _cdiv(n, tn)


def _compiler_params():
    return pltpu.CompilerParams(
        dimension_semantics=("parallel",),     # independent row blocks
        vmem_limit_bytes=48 * 1024 * 1024,
    )


def _bigram_train_kernel(idx_ref, tgt_ref, table_ref, logits_ref, loss_ref):
    # idx_ref, tgt_ref : (TN, 1) int32 token / target ids
    # table_ref        : (V, V)  float32 embedding table (resident block)
    # logits_ref       : (TN, V) float32
    # loss_ref         : (TN, 1) float32 per-row cross-entropy
    tn, v = logits_ref.shape

    idx = idx_ref[...]                                         # (TN, 1)
    tgt = tgt_ref[...]                                         # (TN, 1)
    col = jax.lax.broadcasted_iota(jnp.int32, (tn, v), 1)      # (TN, V)

    # Embedding gather == one_hot(idx) @ table on the MXU.
    one_hot = (col == idx).astype(jnp.float32)                 # (TN, V)
    logits = jnp.dot(one_hot, table_ref[...],
                     preferred_element_type=jnp.float32)       # (TN, V)
    logits_ref[...] = logits

    # Cross-entropy: logsumexp(logits) - logits[target].
    m = jnp.max(logits, axis=-1, keepdims=True)                # (TN, 1)
    lse = jnp.log(jnp.sum(jnp.exp(logits - m), axis=-1,
                          keepdims=True)) + m                  # (TN, 1)
    tgt_logit = jnp.sum(jnp.where(col == tgt, logits, 0.0),
                        axis=-1, keepdims=True)                # (TN, 1)

    # Rows of a partial final block beyond N are never written back (Pallas
    # clips edge-block stores), so no explicit row masking is needed.
    loss_ref[...] = lse - tgt_logit


def _bigram_logits_kernel(idx_ref, table_ref, logits_ref):
    # Inference path: embedding gather only, no cross-entropy work.
    tn, v = logits_ref.shape
    col = jax.lax.broadcasted_iota(jnp.int32, (tn, v), 1)
    one_hot = (col == idx_ref[...]).astype(jnp.float32)
    logits_ref[...] = jnp.dot(one_hot, table_ref[...],
                              preferred_element_type=jnp.float32)


@jax.jit
def _bigram_train(idx, targets, table):
    B, T = idx.shape
    V = table.shape[0]
    N = B * T
    TN, G = _tiling(N)

    idx2 = idx.reshape(N, 1).astype(jnp.int32)
    tgt2 = targets.reshape(N, 1).astype(jnp.int32)
    table_f32 = table.astype(jnp.float32)

    cost = pl.CostEstimate(
        flops=2 * N * V * V,
        transcendentals=N * V,
        bytes_accessed=(N * V + V * V + 3 * N) * 4,
    )

    logits, loss_rows = pl.pallas_call(
        _bigram_train_kernel,
        grid=(G,),
        in_specs=[
            pl.BlockSpec((TN, 1), lambda i: (i, 0)),      # idx block
            pl.BlockSpec((TN, 1), lambda i: (i, 0)),      # target block
            pl.BlockSpec((V, V), lambda i: (0, 0)),       # full table, resident
        ],
        out_specs=(
            pl.BlockSpec((TN, V), lambda i: (i, 0)),      # logits at final shape
            pl.BlockSpec((TN, 1), lambda i: (i, 0)),      # per-row loss
        ),
        out_shape=(
            jax.ShapeDtypeStruct((N, V), jnp.float32),    # no wrapper slice needed
            jax.ShapeDtypeStruct((N, 1), jnp.float32),
        ),
        compiler_params=_compiler_params(),
        cost_estimate=cost,
    )(idx2, tgt2, table_f32)

    loss = jnp.sum(loss_rows) / N          # mean CE over exactly the N rows
    return logits, loss


@jax.jit
def _bigram_infer(idx, table):
    B, T = idx.shape
    V = table.shape[0]
    N = B * T
    TN, G = _tiling(N)

    idx2 = idx.reshape(N, 1).astype(jnp.int32)
    table_f32 = table.astype(jnp.float32)

    cost = pl.CostEstimate(
        flops=2 * N * V * V,
        transcendentals=0,
        bytes_accessed=(N * V + V * V + N) * 4,
    )

    logits = pl.pallas_call(
        _bigram_logits_kernel,
        grid=(G,),
        in_specs=[
            pl.BlockSpec((TN, 1), lambda i: (i, 0)),
            pl.BlockSpec((V, V), lambda i: (0, 0)),
        ],
        out_specs=pl.BlockSpec((TN, V), lambda i: (i, 0)),
        out_shape=jax.ShapeDtypeStruct((N, V), jnp.float32),
        compiler_params=_compiler_params(),
        cost_estimate=cost,
    )(idx2, table_f32)

    return logits.reshape(B, T, V)


def bigram_forward(idx, table, targets=None):
    """Mirrors BigramLanguageModel.forward(idx, targets)."""
    if targets is None:
        return _bigram_infer(idx, table), None
    return _bigram_train(idx, targets, table)


if __name__ == "__main__":
    key = jax.random.PRNGKey(0)
    k_table, k_idx, k_tgt = jax.random.split(key, 3)

    vocab_size = 65   # e.g. tiny-shakespeare character vocab
    B, T = 2, 8

    # Deterministic parameter init: nn.Embedding default is N(0, 1).
    table = jax.random.normal(k_table, (vocab_size, vocab_size), dtype=jnp.float32)
    idx = jax.random.randint(k_idx, (B, T), 0, vocab_size, dtype=jnp.int32)
    targets = jax.random.randint(k_tgt, (B, T), 0, vocab_size, dtype=jnp.int32)

    # Path with targets: logits (B*T, V), scalar loss.
    logits, loss = bigram_forward(idx, table, targets)
    logits = jax.block_until_ready(logits)
    loss = jax.block_until_ready(loss)

    # Path without targets: logits (B, T, V), loss None.
    logits_nt, loss_nt = bigram_forward(idx, table, None)
    logits_nt = jax.block_until_ready(logits_nt)

    # Reference check against plain JAX.
    ref_logits = table[idx.reshape(-1)]
    ref_lse = jax.nn.logsumexp(ref_logits, axis=-1)
    ref_loss = jnp.mean(ref_lse - ref_logits[jnp.arange(B * T), targets.reshape(-1)])

    assert logits.shape == (B * T, vocab_size)
    assert logits_nt.shape == (B, T, vocab_size)
    assert loss_nt is None
    assert jnp.allclose(logits, ref_logits, atol=1e-5)
    assert jnp.allclose(logits_nt.reshape(B * T, vocab_size), ref_logits, atol=1e-5)
    assert jnp.allclose(loss, ref_loss, atol=1e-5)

    # TODO(synk): generate() is a sequential torch.multinomial sampling loop
    # (host-side control flow); it would reuse a fixed-shape, last-token-only
    # variant of the logits kernel per step to avoid per-T recompiles.
    print("KERNEL_OK")
</pallas_src>

<mosaic_0001>
module attributes {stable_mosaic.version = 11 : i64} {
  func.func @_bigram_train_kernel(%arg0: i32, %arg1: memref<8x1xi32, #tpu.memory_space<vmem>>, %arg2: memref<8x1xi32, #tpu.memory_space<vmem>>, %arg3: memref<65x65xf32, #tpu.memory_space<vmem>>, %arg4: memref<8x65xf32, #tpu.memory_space<vmem>>, %arg5: memref<8x1xf32, #tpu.memory_space<vmem>>) attributes {dimension_semantics = [#tpu.dimension_semantics<parallel>], iteration_bounds = array<i64: 2>, scalar_prefetch = 0 : i64, scratch_operands = 0 : i64, tpu.core_type = #tpu.core_type<tc>, window_params = [{transform_indices = @transform_0, window_bounds = array<i64: 8, 1>}, {transform_indices = @transform_1, window_bounds = array<i64: 8, 1>}, {pipeline_mode = #tpu.pipeline_mode<synchronous>, transform_indices = @transform_2, window_bounds = array<i64: 65, 65>}, {transform_indices = @transform_3, window_bounds = array<i64: 8, 65>}, {transform_indices = @transform_4, window_bounds = array<i64: 8, 1>}]} {
    %c0 = arith.constant 0 : index
    %c0_0 = arith.constant 0 : index
    %0 = vector.load %arg1[%c0, %c0_0] : memref<8x1xi32, #tpu.memory_space<vmem>>, vector<8x1xi32>
    %c0_1 = arith.constant 0 : index
    %c0_2 = arith.constant 0 : index
    %1 = vector.load %arg2[%c0_1, %c0_2] : memref<8x1xi32, #tpu.memory_space<vmem>>, vector<8x1xi32>
    %2 = tpu.iota {dimensions = array<i32: 1>} : vector<8x65xi32>
    %3 = vector.broadcast %0 : vector<8x1xi32> to vector<8x65xi32>
    %4 = arith.cmpi eq, %2, %3 : vector<8x65xi32>
    %5 = arith.extui %4 : vector<8x65xi1> to vector<8x65xi32>
    %6 = arith.sitofp %5 : vector<8x65xi32> to vector<8x65xf32>
    %c0_3 = arith.constant 0 : index
    %c0_4 = arith.constant 0 : index
    %7 = vector.load %arg3[%c0_3, %c0_4] : memref<65x65xf32, #tpu.memory_space<vmem>>, vector<65x65xf32>
    %cst = arith.constant dense<0.000000e+00> : vector<8x65xf32>
    %8 = tpu.matmul %6, %7, %cst {dimension_numbers = #tpu.dot_dimension_numbers<[1], [0], [0], [1], [0, 0, 1, 1], [], []>} : vector<8x65xf32>, vector<65x65xf32>, vector<8x65xf32> -> vector<8x65xf32>
    %c0_5 = arith.constant 0 : index
    %c0_6 = arith.constant 0 : index
    %9 = vector.load %arg4[%c0_5, %c0_6] : memref<8x65xf32, #tpu.memory_space<vmem>>, vector<8x65xf32>
    tpu.vector_store %arg4[%c0_5, %c0_6], %8 {strides = array<i32>} : memref<8x65xf32, #tpu.memory_space<vmem>>, vector<8x65xf32>,
    %cst_7 = arith.constant dense<0xFF800000> : vector<8xf32>
    %10 = vector.multi_reduction <maximumf>, %8, %cst_7 [1] : vector<8x65xf32> to vector<8xf32>
    %11 = vector.shape_cast %10 : vector<8xf32> to vector<8x1xf32>
    %12 = vector.broadcast %11 : vector<8x1xf32> to vector<8x65xf32>
    %13 = arith.subf %8, %12 : vector<8x65xf32>
    %14 = math.exp %13 : vector<8x65xf32>
    %cst_8 = arith.constant dense<0.000000e+00> : vector<8xf32>
    %15 = vector.multi_reduction <add>, %14, %cst_8 [1] : vector<8x65xf32> to vector<8xf32>
    %16 = vector.shape_cast %15 : vector<8xf32> to vector<8x1xf32>
    %17 = math.log %16 : vector<8x1xf32>
    %18 = arith.addf %17, %11 : vector<8x1xf32>
    %19 = vector.broadcast %1 : vector<8x1xi32> to vector<8x65xi32>
    %20 = arith.cmpi eq, %2, %19 : vector<8x65xi32>
    %cst_9 = arith.constant 0.000000e+00 : f32
    %21 = vector.broadcast %cst_9 : f32 to vector<8x65xf32>
    %22 = arith.select %20, %8, %21 : vector<8x65xi1>, vector<8x65xf32>
    %cst_10 = arith.constant dense<0.000000e+00> : vector<8xf32>
    %23 = vector.multi_reduction <add>, %22, %cst_10 [1] : vector<8x65xf32> to vector<8xf32>
    %24 = vector.shape_cast %23 : vector<8xf32> to vector<8x1xf32>
    %25 = arith.subf %18, %24 : vector<8x1xf32>
    %c0_11 = arith.constant 0 : index
    %c0_12 = arith.constant 0 : index
    %26 = vector.load %arg5[%c0_11, %c0_12] : memref<8x1xf32, #tpu.memory_space<vmem>>, vector<8x1xf32>
    tpu.vector_store %arg5[%c0_11, %c0_12], %25 {strides = array<i32>} : memref<8x1xf32, #tpu.memory_space<vmem>>, vector<8x1xf32>,
    return
  }
  func.func @transform_0(%arg0: i32) -> (i32, i32) {
    %c0_i32 = arith.constant 0 : i32
    %c0_i32_0 = arith.constant 0 : i32
    return %arg0, %c0_i32 : i32, i32
  }
  func.func @transform_1(%arg0: i32) -> (i32, i32) {
    %c0_i32 = arith.constant 0 : i32
    %c0_i32_0 = arith.constant 0 : i32
    return %arg0, %c0_i32 : i32, i32
  }
  func.func @transform_2(%arg0: i32) -> (i32, i32) {
    %c0_i32 = arith.constant 0 : i32
    %c0_i32_0 = arith.constant 0 : i32
    %c0_i32_1 = arith.constant 0 : i32
    return %c0_i32, %c0_i32_0 : i32, i32
  }
  func.func @transform_3(%arg0: i32) -> (i32, i32) {
    %c0_i32 = arith.constant 0 : i32
    %c0_i32_0 = arith.constant 0 : i32
    return %arg0, %c0_i32 : i32, i32
  }
  func.func @transform_4(%arg0: i32) -> (i32, i32) {
    %c0_i32 = arith.constant 0 : i32
    %c0_i32_0 = arith.constant 0 : i32
    return %arg0, %c0_i32 : i32, i32
  }
}

</mosaic_0001>

<bundles_post_ra>
// kernel: _bigram_train.1
= control target key start
LH: loop header
LB: loop body
LE: loop exit
PB: predicated region body
PF: predicated region fallthrough
CT: control target
= control target key end

     0   :  { %10 = vsyncpa [#allocation3], 0  ;;  %s839_s0 = inlined_call_operand.vmem [shape: s32[16,1], index: 0, kind: input, shape index: {}]   ;;  %s840_s1 = inlined_call_operand.vmem [shape: s32[16,1], index: 1, kind: input, shape index: {}]   ;;  %s841_s2 = inlined_call_operand.hbm [shape: f32[65,65], index: 2, kind: input, shape index: {}]   ;;  %s842_s3 = inlined_call_operand.hbm [shape: f32[16,65], index: 3, kind: output, shape index: {0}]   ;;  %s843_s4 = inlined_call_operand.vmem [shape: f32[16,1], index: 4, kind: output, shape index: {1}]  }
   0x1   :  { %11 = vsyncpa [#allocation4], 0 }
   0x2   :  { %13 = vsyncpa [#allocation4 + $0x1], 0  ;;  %s718_s15 = smov 0   ;;  %s720_s16 = smov 0  }
   0x3   :  { %s722_s17 = smov 0   ;;  %s724_s18 = smov 0  }
   0x4 LB: > { %s739_s19 = sadd.s32 4294967295, %s684_s18   ;;  %s485_s20 = sadd.s32 4294967294, %s684_s18   ;;  %s684_s18 = sphi %s724_s18, %s851_s18   ;;  %s680_s17 = sphi %s722_s17, %s850_s17   ;;  %s676_s16 = sphi %s720_s16, %s849_s16   ;;  %s672_s15 = sphi %s718_s15, %s848_s15  }
   0x5   : > { %s743_s21 = sadd.s32 1, %s684_s18   ;;  %s99_s22 = sadd.s32 1, %s680_s17 }
   0x6   : > { %s96_s23 = ssub.s32 %s684_s18, %s743_s21  ;;  %p109_p0 = scmp.ne.s32.totalorder %s680_s17, %s676_s16 }
   0x7   : > { %p97_p1 = scmp.eq.s32.totalorder %s96_s23, 0  ;;  %p110_p2 = scmp.eq.s32.totalorder %s739_s19, 1 }
   0x8   : > { %p115_p3 = scmp.ne.s32.totalorder %s676_s16, %s672_s15  ;;  %p116_p4 = scmp.eq.s32.totalorder %s485_s20, 1 }
   0x9   : > { %s754_s24 = scalar_select %p97_p1, %s680_s17, %s99_s22  }
   0xa   : > { %p756_p5 = por %p110_p2, %p109_p0  ;;  %p760_p6 = por %p116_p4, %p115_p3 }
   0xb   : > { %p486_p7 = scmp.ge.s32.totalorder %s684_s18, 1  ;;  %p149_p8 = scmp.lt.s32.totalorder %s684_s18, 3 }
   0xc   : > { %s845_s26 = scalar_select %p760_p6, 1, 0 }
   0xd   : > { %p547_p9 = scmp.eq.s32.totalorder %s739_s19, 0  ;;  %p767_p10 = pnand %p486_p7, %p149_p8 }
   0xe   : > { %s686_s28 = smov [#allocation2]  }
   0xf   : > { %s161_s29 = sshll.u32 %s686_s28, 4  ;;  %p539_p11 = pneg %p767_p10  ;;  %s162_s29 = int_to_ptr.vmem [resolvable:$true] %s161_s29 }
  0x10   : > { %s605_s30 = scalar_lea.vmem %s162_s29, 1152  ;;  %p613_p3 = scmp.lt.s32.totalorder %s162_s29, %s162_s29 }
  0x11   : > { %p540_p12 = pnand %p547_p9, %p539_p11  ;;  %p606_p0 = scmp.ne.s32.totalorder %s162_s29, %s605_s30 }
  0x12   : > { %p614_p4 = scmp.lt.s32.totalorder %s605_s30, %s605_s30 }
  0x13   : > { %p596_p13 = pneg %p540_p12 }
  0x14   : > { %p615_p6 = por %p614_p4, %p613_p3 }
  0x15   : > { %p608_p1 = pnand %p606_p0, %p596_p13 }
  0x17   : > { %p609_p2 = pneg %p608_p1 }
  0x19   : > { %p616_p7 = pnand %p615_p6, %p609_p2 }
  0x1b   : > { %619 = shalt.err (!%p616_p7)
}
  0x1c   : > { %s687_s5 = smov 128   ;;  %s688_s6 = smov 8  }
  0x1d   : > { %542 = dma.hbm_to_vmem [thread:$0]  (!%p540_p12), %s841_s2, 1152, %s162_s29, [#allocation3], %s687_s5, %s687_s5, %s688_s6  }
  0x1e   : > { %191 = sbr.rel (%p767_p10) target bundleno = 679 (0x2a7), region = 32 }
  0x23   : > { %663 = dma.done.wait (%p547_p9), [#allocation3], 1152  }
  0x24   : > { %665 = vsyncadd (%p547_p9), [#allocation3], 4294966144  ;;  %p224_p8 = scmp.lt.s32.totalorder %s739_s19, 1  ;;  %v689_v0 = vmov 0   ;;  %v690_v1 = vmov 0.0   ;;  %vm259_vm0 = vcmask 1040384   ;;  %v238_v13 = vlaneseq }
  0x25   : > { %588 = vset.pattern.permute.xlu0 %v689_v0  ;;  %512 = vmatprep.subr.mxu0 %v690_v1  ;;  %vm691_vm1 = vmmov 0   ;;  %v254_v3 = vld [vmem:[#allocation2 + $0x40] sm:$0x1]  ;;  %v253_v4 = vld [vmem:[#allocation2 + $0x38] sm:$0xff]  ;;  %v252_v5 = vld [vmem:[#allocation2 + $0x30] sm:$0xff]  ;;  %vm255_vm2 = vcmask 531456  }
  0x26   : > { %s225_s9 = scalar_select %p224_p8, %s739_s19, 1  ;;  %589 = vset.pattern.permute.xlu1 %v689_v0  ;;  %530 = vmatprep.mubr.msk.f32.mxu0 %vm691_vm1, %v690_v1  ;;  %v251_v7 = vld [vmem:[#allocation2 + $0x28] sm:$0xff]  ;;  %v250_v8 = vld [vmem:[#allocation2 + $0x20] sm:$0xff]  ;;  %v249_v9 = vld [vmem:[#allocation2 + $0x18] sm:$0xff]  ;;  %v239_v14 = vand.u32 127, %v238_v13 }
  0x27   : > { %513 = vmatpush3.msk.msra.mxu0 %vm259_vm0, %v254_v3  ;;  %v248_v10 = vld [vmem:[#allocation2 + $0x10] sm:$0xff]  ;;  %v247_v11 = vld [vmem:[#allocation2 + $0x8] sm:$0xff]  ;;  %v246_v12 = vld [vmem:[#allocation2] sm:$0xff]  ;;  %s215_s23 = sand.u32 1, %s676_s16   ;;  %s499_s29 = sshll.u32 %s739_s19, 7 }
  0x28   : > { %s786_s10 = sshll.u32 %s225_s9, 3  ;;  %514 = vmatprep.subr.mxu0 %v690_v1  ;;  %s491_s27 = sshll.u32 %s215_s23, 3 }
  0x29   : > { %s227_s13 = scalar_lea.vmem %s839_s0, %s786_s10  ;;  %s231_s22 = scalar_lea.vmem %s840_s1, %s786_s10  ;;  %515 = vmatpush3.msra.mxu0 %v253_v4 }
  0x2a   : > { %v236_v2 = vld [vmem:[%s227_s13] sm:$0xff]  ;;  %516 = vmatprep.subr.mxu0 %v690_v1  ;;  %s217_s28 = scalar_lea.vmem [#allocation5], %s491_s27  ;;  %s373_s7 = scalar_lea.hbm %s842_s3, %s499_s29 }
  0x2b   : > { %241 = vperm.xlu0 %588, %v236_v2   ;;  %v237_v6 = vld [vmem:[%s231_s22] sm:$0xff]  ;;  %517 = vmatpush3.msra.mxu0 %v252_v5  ;;  %s375_s30 = sshll.u32 %s217_s28, 4  ;;  %s358_s8 = scalar_lea.sflag [#allocation4], %s215_s23  ;;  %s376_s30 = int_to_ptr.vmem [resolvable:$true] %s375_s30 }
  0x2c   : > { %347 = vperm.xlu1 %589, %v237_v6   ;;  %518 = vmatprep.subr.mxu0 %v690_v1  ;;  %s620_s9 = scalar_lea.vmem %s376_s30, 128  ;;  %s692_s11 = smov [#allocation5]  }
  0x2d   : > { %519 = vmatpush3.msra.mxu0 %v251_v7  ;;  %p621_p6 = scmp.ne.s32.totalorder %s376_s30, %s620_s9  ;;  %s624_s12 = sshll.u32 %s692_s11, 4  ;;  %s625_s12 = int_to_ptr.vmem [resolvable:$false] %s624_s12 }
  0x2e   : > { %520 = vmatprep.subr.mxu0 %v690_v1  ;;  %s626_s13 = scalar_lea.vmem %s625_s12, 256  ;;  %p627_p11 = scmp.lt.s32.totalorder %s376_s30, %s625_s12 }
  0x2f   : > { %521 = vmatpush3.msra.mxu0 %v250_v8  ;;  %p622_p9 = pnand %p621_p6, %p756_p5  ;;  %p628_p12 = scmp.lt.s32.totalorder %s626_s13, %s620_s9 }
  0x30   : > { %522 = vmatprep.subr.mxu0 %v690_v1 }
  0x31   : > { %523 = vmatpush3.msra.mxu0 %v249_v9  ;;  %p623_p10 = pneg %p622_p9  ;;  %p629_p13 = por %p628_p12, %p627_p11 }
  0x32   : > { %524 = vmatprep.subr.mxu0 %v690_v1 }
  0x33   : > { %525 = vmatpush3.msra.mxu0 %v248_v10  ;;  %p630_p0 = pnand %p629_p13, %p623_p10 }
  0x34   : > { %526 = vmatprep.subr.mxu0 %v690_v1 }
  0x35   : > { %527 = vmatpush3.msra.mxu0 %v247_v11 }
  0x36   : > { %528 = vmatprep.subr.mxu0 %v690_v1 }
  0x37   : > { %529 = vmatpush3.msra.mxu0 %v246_v12 }
  0xa6   : > { %v242_v15 = vpop.permute.xlu0 %241 }
  0xa7   : > { %vm243_vm3 = vcmp.eq.s32.totalorder %v239_v14, %v242_v15  ;;  %v348_v17 = vpop.permute.xlu1 %347 }
  0xa8   : > { %v495_v16 = vsel %vm243_vm3, 1.0, %v690_v1  ;;  %vm349_vm4 = vcmp.eq.s32.totalorder %v239_v14, %v348_v17 }
  0xa9   : > { %531 = vmatmul.mubr.msk.f32.vlgmr.msra.gmra.mxu0 %vm255_vm2, %v495_v16 }
 0x169   : > { %v329_v18 = vpop.f32.mrf.mxu0 }
 0x16a   : > { %v334_v19 = vsel %vm255_vm2, %v329_v18, -inf  ;;  %333 = vst.msk [vmem:[%s217_s28] sm:$0xff] %vm255_vm2, %v329_v18  ;;  %v350_v21 = vsel %vm349_vm4, %v329_v18, 0.0 }
 0x16b   : > { %335 = vmax.xlane.f32.xlu0 %v334_v19  ;;  %v532_v20 = vpop.f32.mrf.mxu0  ;;  %v351_v22 = vsel %vm255_vm2, %v350_v21, 0.0 }
 0x16f   : > { %352 = vadd.xlane.f32.xlu0 %v351_v22 }
 0x1f4   : > { %v336_v23 = vpop.xlane.xlu0 %335 }
 0x1f5   : > { %v337_v24 = vsub.f32 %v329_v18, %v336_v23 }
 0x1f7   : > { %v338_v25 = vmul.f32 1.442695, %v337_v24 }
 0x1f9   : > { %590 = vpow2.f32 %v338_v25 }
 0x206   : > { %v591_v26 = vpop.eup %590 }
 0x207   : > { %v340_v27 = vsel %vm255_vm2, %v591_v26, 0.0 }
 0x208   : > { %341 = vadd.xlane.f32.xlu1 %v340_v27 }
 0x209   : > { %633 = shalt.err (!%p630_p0)
}
 0x20a   : > { %s634_s19 = scalar_lea.hbm %s373_s7, 128  ;;  %s638_s22 = scalar_lea.hbm %s842_s3, 256 }
 0x20b   : > { %p635_p1 = scmp.ne.s32.totalorder %s373_s7, %s634_s19  ;;  %p639_p4 = scmp.lt.s32.totalorder %s373_s7, %s842_s3 }
 0x20c   : > { %p640_p7 = scmp.lt.s32.totalorder %s638_s22, %s634_s19 }
 0x20d   : > { %p636_p2 = pnand %p635_p1, %p756_p5 }
 0x20e   : > { %p641_p8 = por %p640_p7, %p639_p4 }
 0x20f   : > { %p637_p3 = pneg %p636_p2 }
 0x211   : > { %p642_p6 = pnand %p641_p8, %p637_p3 }
 0x213   : > { %645 = shalt.err (!%p642_p6)
}
 0x214   : > { %537 = dma.vmem_to_hbm [thread:$0]  (%p756_p5), %s376_s30, 128, %s373_s7, %s358_s8   ;;  %v353_v32 = vpop.xlane.xlu0 %352  ;;  %vm355_vm5 = vcmask 7168  }
 0x215   : > { %s235_s5 = scalar_lea.vmem %s843_s4, %s786_s10 }
 0x291   : > { %v342_v28 = vpop.xlane.xlu1 %341 }
 0x292   : > { %592 = vlog2.f32 %v342_v28 }
 0x29f   : > { %v593_v29 = vpop.eup %592 }
 0x2a0   : > { %v344_v30 = vmul.f32 0.6931472, %v593_v29 }
 0x2a2   : > { %v345_v31 = vadd.f32 %v344_v30, %v336_v23 }
 0x2a4   : > { %v354_v33 = vsub.f32 %v345_v31, %v353_v32 }
 0x2a6   : > { %356 = vst.msk [vmem:[%s235_s5] sm:$0xff] %vm355_vm5, %v354_v33 }
 0x2a7 PF: > { %p549_p9 = scmp.ge.s32.totalorder %s684_s18, 2  ;;  %s390_s25 = sand.u32 1, %s672_s15  }
 0x2a8   : > { %p847_p5 = scmp.ne.s32.totalorder %s845_s26, 0  ;;  %s391_s30 = scalar_lea.sflag [#allocation4], %s390_s25 }
 0x2aa   : > { %p544_p10 = pnand %p549_p9, %p847_p5 }
 0x2ac   : > { %p545_p11 = pneg %p544_p10 }
 0x2ae   : > { %667 = dma.done.wait (%p545_p11), %s391_s30, 128  }
 0x2af   : > { %669 = vsyncadd (%p545_p11), %s391_s30, 4294967168  ;;  %p16_p12 = scmp.ge.s32.totalorder %s743_s21, 4   ;;  %s848_s15 = smov %s676_s16 }
 0x2b0   : > { %s849_s16 = smov %s680_s17  ;;  %s850_s17 = smov %s754_s24 }
 0x2b1   : > { %s851_s18 = smov %s743_s21  ;;  %18 = sbr.rel (!%p16_p12) target bundleno = 4 (0x4), region = 87 }
 0x2b6   :  { %403 = vsyncpa [#allocation3], 1 }
 0x2b7   :  { %405 = vsyncpa [#allocation3 + $0x1], 1 }
 0x2b8   :  { %406 = vsyncpa [#allocation4], 1 }
 0x2b9   :  { %408 = vsyncpa [#allocation4 + $0x1], 1 }

</bundles_post_ra>
